<compile_context>
chip_gen: v6e
topology: v6e:2x2x1
jax: 0.10.0
libtpu: 0.0.40
codegen_flags: <defaults>
</compile_context>

<pallas_src>
import jax
import jax.numpy as jnp
from jax.experimental import pallas as pl
from jax.experimental.pallas import tpu as pltpu

HIDDEN_DIMS = [64, 32, 16]
BN_EPS = 1e-5
TILE_N_MAX = 32768


def _round_up(x, m):
    return (x + m - 1) // m * m


def _choose_tiling(n, tile_n_max):
    n_eff = max(n, 1)
    num_tiles = pl.cdiv(n_eff, tile_n_max)
    # Ensure >= 2 grid steps whenever the batch is big enough for two >=128-row
    # tiles, so dimension_semantics=("parallel",) can shard across v7x's 2 TCs.
    if num_tiles == 1 and n_eff > 128:
        num_tiles = 2
    tile_n = _round_up(pl.cdiv(n_eff, num_tiles), 128)
    padded_n = num_tiles * tile_n
    return num_tiles, tile_n, padded_n


def _mlp_kernel(x_ref,
                w0_ref, b0_ref, w1_ref, b1_ref, w2_ref, b2_ref, w3_ref, b3_ref,
                o_ref):
    """Fused MLP on one batch tile. Activations live as (features, TILE_N)."""
    # x_ref: (input_dim, TILE_N) bf16 -- already transposed & lane-dense.
    h = jnp.dot(w0_ref[...], x_ref[...], preferred_element_type=jnp.float32)
    h = jnp.maximum(h + b0_ref[...], 0.0).astype(jnp.bfloat16)      # (64, TILE_N)

    h = jnp.dot(w1_ref[...], h, preferred_element_type=jnp.float32)
    h = jnp.maximum(h + b1_ref[...], 0.0).astype(jnp.bfloat16)      # (32, TILE_N)

    h = jnp.dot(w2_ref[...], h, preferred_element_type=jnp.float32)
    h = jnp.maximum(h + b2_ref[...], 0.0)                           # (16, TILE_N) f32

    # Head: (1,16)@(16,TILE_N) done as VPU broadcast-mults + XLU sublane reduce
    # (an M=1 MXU matmul wastes 7/8 of the output sublanes for no gain).
    y = jnp.sum(h * w3_ref[...], axis=0, keepdims=True) + b3_ref[...]  # (1, TILE_N)
    o_ref[...] = y


def simple_jet_mlp_forward(x, folded_params, *, tile_n_max=TILE_N_MAX):
    """x: (N, input_dim) float32 -> (N,) float32 (eval-mode forward)."""
    n, input_dim = x.shape
    num_tiles, tile_n, padded_n = _choose_tiling(n, tile_n_max)

    # bf16 + transposed (input_dim, N) layout: dense lanes, half the input DMA.
    xt = x.astype(jnp.bfloat16).T                       # (input_dim, n)
    if padded_n != n:
        xt = jnp.pad(xt, ((0, 0), (0, padded_n - n)))   # pad cols sliced off below

    in_specs = [pl.BlockSpec((input_dim, tile_n), lambda i: (0, i))]
    # Weights/biases: full-array blocks, constant index_map -> VMEM-resident.
    in_specs += [pl.BlockSpec(p.shape, lambda i: (0, 0)) for p in folded_params]
    out_spec = pl.BlockSpec((1, tile_n), lambda i: (0, i))   # lane-dense output row

    out = pl.pallas_call(
        _mlp_kernel,
        out_shape=jax.ShapeDtypeStruct((1, padded_n), jnp.float32),
        grid=(num_tiles,),
        in_specs=in_specs,
        out_specs=out_spec,
        compiler_params=pltpu.CompilerParams(
            dimension_semantics=("parallel",),       # megacore-shard the batch axis
            vmem_limit_bytes=48 * 1024 * 1024,       # fits v7x's 64 MiB per-TC VMEM
        ),
    )(xt, *folded_params)
    return out.reshape(padded_n)[:n]


def init_raw_params(key, input_dim, hidden_dims=HIDDEN_DIMS):
    """Parameters in PyTorch layout: per hidden layer (W(out,in), b, gamma, beta,
    running_mean, running_var); final (W(1,prev), b).  Linear weights follow
    SimpleJetMLP.__init__ (xavier_uniform, zero bias); BN stats/affine are
    randomized to stand in for a trained checkpoint (pristine init is 0/1/1/0)."""
    layers = []
    prev = input_dim
    keys = jax.random.split(key, 5 * len(hidden_dims) + 1)
    ki = 0
    for h in hidden_dims:
        bound = (6.0 / (prev + h)) ** 0.5
        w = jax.random.uniform(keys[ki], (h, prev), jnp.float32, -bound, bound); ki += 1
        b = jnp.zeros((h,), jnp.float32)
        gamma = jax.random.uniform(keys[ki], (h,), jnp.float32, 0.5, 1.5); ki += 1
        beta = 0.1 * jax.random.normal(keys[ki], (h,), jnp.float32); ki += 1
        mean = 0.1 * jax.random.normal(keys[ki], (h,), jnp.float32); ki += 1
        var = jax.random.uniform(keys[ki], (h,), jnp.float32, 0.5, 1.5); ki += 1
        layers.append((w, b, gamma, beta, mean, var))
        prev = h
    bound = (6.0 / (prev + 1)) ** 0.5
    w_out = jax.random.uniform(keys[ki], (1, prev), jnp.float32, -bound, bound)
    b_out = jnp.zeros((1,), jnp.float32)
    return layers, (w_out, b_out)


def fold_params(raw):
    """Fold eval-mode BN (+ linear bias) into per-layer weights.

    Hidden layers: W' = (scale * W) cast to bf16, b' = (scale*b + shift) in f32.
    Head: weight stored as (prev, 1) f32 column (consumed by the VPU head)."""
    layers, (w_out, b_out) = raw
    folded = []
    for (w, b, gamma, beta, mean, var) in layers:
        scale = gamma / jnp.sqrt(var + BN_EPS)
        shift = beta - mean * scale
        folded.append((w * scale[:, None]).astype(jnp.bfloat16))   # (out, in) bf16
        folded.append((scale * b + shift)[:, None])                # (out, 1) f32
    folded.append(jnp.transpose(w_out).astype(jnp.float32))        # (prev, 1) f32
    folded.append(b_out[:, None])                                  # (1, 1) f32
    return folded


def reference_forward(x, raw):
    """Pure-JAX f32 eval-mode reference matching the PyTorch module semantics."""
    layers, (w_out, b_out) = raw
    h = x
    for (w, b, gamma, beta, mean, var) in layers:
        h = h @ w.T + b
        h = (h - mean) / jnp.sqrt(var + BN_EPS) * gamma + beta  # BatchNorm1d (eval)
        h = jnp.maximum(h, 0.0)                                 # ReLU; Dropout = identity (eval)
    return (h @ w_out.T + b_out)[:, 0]


def reference_forward_folded(x, folded):
    """Pure-JAX reference using the same bf16-matmul arithmetic as the kernel."""
    w0, b0, w1, b1, w2, b2, w3, b3 = folded
    h = x.astype(jnp.bfloat16).T
    h = jnp.maximum(jnp.dot(w0, h, preferred_element_type=jnp.float32) + b0, 0.0).astype(jnp.bfloat16)
    h = jnp.maximum(jnp.dot(w1, h, preferred_element_type=jnp.float32) + b1, 0.0).astype(jnp.bfloat16)
    h = jnp.maximum(jnp.dot(w2, h, preferred_element_type=jnp.float32) + b2, 0.0)
    y = jnp.sum(h * w3, axis=0, keepdims=True) + b3
    return y[0]


if __name__ == "__main__":
    key = jax.random.PRNGKey(0)
    k_x, k_p, k_x2 = jax.random.split(key, 3)

    input_dim = 16
    raw = init_raw_params(k_p, input_dim)
    params = fold_params(raw)

    # Small demo batch (single tile).
    x = jax.random.normal(k_x, (8, input_dim), jnp.float32)
    y = jax.block_until_ready(simple_jet_mlp_forward(x, params))
    assert y.shape == (8,), y.shape
    y_ref_bf16 = reference_forward_folded(x, params)
    y_ref_f32 = reference_forward(x, raw)
    assert jnp.allclose(y, y_ref_bf16, atol=2e-3, rtol=2e-3), jnp.max(jnp.abs(y - y_ref_bf16))
    assert jnp.allclose(y, y_ref_f32, atol=5e-2, rtol=5e-2), jnp.max(jnp.abs(y - y_ref_f32))

    # Multi-tile + ragged batch: exercises the grid and the padded last columns.
    x2 = jax.random.normal(k_x2, (300, input_dim), jnp.float32)
    y2 = jax.block_until_ready(simple_jet_mlp_forward(x2, params, tile_n_max=128))
    assert y2.shape == (300,), y2.shape
    y2_ref_bf16 = reference_forward_folded(x2, params)
    y2_ref_f32 = reference_forward(x2, raw)
    assert jnp.allclose(y2, y2_ref_bf16, atol=2e-3, rtol=2e-3), jnp.max(jnp.abs(y2 - y2_ref_bf16))
    assert jnp.allclose(y2, y2_ref_f32, atol=5e-2, rtol=5e-2), jnp.max(jnp.abs(y2 - y2_ref_f32))

    # TODO(synk): training-mode Dropout / BatchNorm batch-statistics are not
    # implemented (eval-mode forward only, matching model.eval()).
    print("KERNEL_OK")
</pallas_src>

<mosaic_0001>
module attributes {stable_mosaic.version = 11 : i64} {
  func.func @_mlp_kernel(%arg0: i32, %arg1: memref<16x128xbf16, #tpu.memory_space<vmem>>, %arg2: memref<64x16xbf16, #tpu.memory_space<vmem>>, %arg3: memref<64x1xf32, #tpu.memory_space<vmem>>, %arg4: memref<32x64xbf16, #tpu.memory_space<vmem>>, %arg5: memref<32x1xf32, #tpu.memory_space<vmem>>, %arg6: memref<16x32xbf16, #tpu.memory_space<vmem>>, %arg7: memref<16x1xf32, #tpu.memory_space<vmem>>, %arg8: memref<16x1xf32, #tpu.memory_space<vmem>>, %arg9: memref<1x1xf32, #tpu.memory_space<vmem>>, %arg10: memref<1x128xf32, #tpu.memory_space<vmem>>) attributes {dimension_semantics = [#tpu.dimension_semantics<parallel>], iteration_bounds = array<i64: 1>, scalar_prefetch = 0 : i64, scratch_operands = 0 : i64, tpu.core_type = #tpu.core_type<tc>, window_params = [{transform_indices = @transform_0, window_bounds = array<i64: 16, 128>}, {pipeline_mode = #tpu.pipeline_mode<synchronous>, transform_indices = @transform_1, window_bounds = array<i64: 64, 16>}, {pipeline_mode = #tpu.pipeline_mode<synchronous>, transform_indices = @transform_2, window_bounds = array<i64: 64, 1>}, {pipeline_mode = #tpu.pipeline_mode<synchronous>, transform_indices = @transform_3, window_bounds = array<i64: 32, 64>}, {pipeline_mode = #tpu.pipeline_mode<synchronous>, transform_indices = @transform_4, window_bounds = array<i64: 32, 1>}, {pipeline_mode = #tpu.pipeline_mode<synchronous>, transform_indices = @transform_5, window_bounds = array<i64: 16, 32>}, {pipeline_mode = #tpu.pipeline_mode<synchronous>, transform_indices = @transform_6, window_bounds = array<i64: 16, 1>}, {pipeline_mode = #tpu.pipeline_mode<synchronous>, transform_indices = @transform_7, window_bounds = array<i64: 16, 1>}, {pipeline_mode = #tpu.pipeline_mode<synchronous>, transform_indices = @transform_8, window_bounds = array<i64: 1, 1>}, {transform_indices = @transform_9, window_bounds = array<i64: 1, 128>}]} {
    %c0 = arith.constant 0 : index
    %c0_0 = arith.constant 0 : index
    %0 = vector.load %arg2[%c0, %c0_0] : memref<64x16xbf16, #tpu.memory_space<vmem>>, vector<64x16xbf16>
    %c0_1 = arith.constant 0 : index
    %c0_2 = arith.constant 0 : index
    %1 = vector.load %arg1[%c0_1, %c0_2] : memref<16x128xbf16, #tpu.memory_space<vmem>>, vector<16x128xbf16>
    %cst = arith.constant dense<0.000000e+00> : vector<64x128xf32>
    %2 = tpu.matmul %0, %1, %cst {dimension_numbers = #tpu.dot_dimension_numbers<[1], [0], [0], [1], [0, 0, 1, 1], [], []>} : vector<64x16xbf16>, vector<16x128xbf16>, vector<64x128xf32> -> vector<64x128xf32>
    %c0_3 = arith.constant 0 : index
    %c0_4 = arith.constant 0 : index
    %3 = vector.load %arg3[%c0_3, %c0_4] : memref<64x1xf32, #tpu.memory_space<vmem>>, vector<64x1xf32>
    %4 = vector.broadcast %3 : vector<64x1xf32> to vector<64x128xf32>
    %5 = arith.addf %2, %4 : vector<64x128xf32>
    %cst_5 = arith.constant 0.000000e+00 : f32
    %6 = vector.broadcast %cst_5 : f32 to vector<64x128xf32>
    %7 = arith.maximumf %5, %6 : vector<64x128xf32>
    %8 = arith.truncf %7 : vector<64x128xf32> to vector<64x128xbf16>
    %c0_6 = arith.constant 0 : index
    %c0_7 = arith.constant 0 : index
    %9 = vector.load %arg4[%c0_6, %c0_7] : memref<32x64xbf16, #tpu.memory_space<vmem>>, vector<32x64xbf16>
    %cst_8 = arith.constant dense<0.000000e+00> : vector<32x128xf32>
    %10 = tpu.matmul %9, %8, %cst_8 {dimension_numbers = #tpu.dot_dimension_numbers<[1], [0], [0], [1], [0, 0, 1, 1], [], []>} : vector<32x64xbf16>, vector<64x128xbf16>, vector<32x128xf32> -> vector<32x128xf32>
    %c0_9 = arith.constant 0 : index
    %c0_10 = arith.constant 0 : index
    %11 = vector.load %arg5[%c0_9, %c0_10] : memref<32x1xf32, #tpu.memory_space<vmem>>, vector<32x1xf32>
    %12 = vector.broadcast %11 : vector<32x1xf32> to vector<32x128xf32>
    %13 = arith.addf %10, %12 : vector<32x128xf32>
    %cst_11 = arith.constant 0.000000e+00 : f32
    %14 = vector.broadcast %cst_11 : f32 to vector<32x128xf32>
    %15 = arith.maximumf %13, %14 : vector<32x128xf32>
    %16 = arith.truncf %15 : vector<32x128xf32> to vector<32x128xbf16>
    %c0_12 = arith.constant 0 : index
    %c0_13 = arith.constant 0 : index
    %17 = vector.load %arg6[%c0_12, %c0_13] : memref<16x32xbf16, #tpu.memory_space<vmem>>, vector<16x32xbf16>
    %cst_14 = arith.constant dense<0.000000e+00> : vector<16x128xf32>
    %18 = tpu.matmul %17, %16, %cst_14 {dimension_numbers = #tpu.dot_dimension_numbers<[1], [0], [0], [1], [0, 0, 1, 1], [], []>} : vector<16x32xbf16>, vector<32x128xbf16>, vector<16x128xf32> -> vector<16x128xf32>
    %c0_15 = arith.constant 0 : index
    %c0_16 = arith.constant 0 : index
    %19 = vector.load %arg7[%c0_15, %c0_16] : memref<16x1xf32, #tpu.memory_space<vmem>>, vector<16x1xf32>
    %20 = vector.broadcast %19 : vector<16x1xf32> to vector<16x128xf32>
    %21 = arith.addf %18, %20 : vector<16x128xf32>
    %cst_17 = arith.constant 0.000000e+00 : f32
    %22 = vector.broadcast %cst_17 : f32 to vector<16x128xf32>
    %23 = arith.maximumf %21, %22 : vector<16x128xf32>
    %c0_18 = arith.constant 0 : index
    %c0_19 = arith.constant 0 : index
    %24 = vector.load %arg8[%c0_18, %c0_19] : memref<16x1xf32, #tpu.memory_space<vmem>>, vector<16x1xf32>
    %25 = vector.broadcast %24 : vector<16x1xf32> to vector<16x128xf32>
    %26 = arith.mulf %23, %25 : vector<16x128xf32>
    %cst_20 = arith.constant dense<0.000000e+00> : vector<128xf32>
    %27 = vector.multi_reduction <add>, %26, %cst_20 [0] : vector<16x128xf32> to vector<128xf32>
    %28 = vector.shape_cast %27 : vector<128xf32> to vector<1x128xf32>
    %c0_21 = arith.constant 0 : index
    %c0_22 = arith.constant 0 : index
    %29 = vector.load %arg9[%c0_21, %c0_22] : memref<1x1xf32, #tpu.memory_space<vmem>>, vector<1x1xf32>
    %30 = vector.broadcast %29 : vector<1x1xf32> to vector<1x128xf32>
    %31 = arith.addf %28, %30 : vector<1x128xf32>
    %c0_23 = arith.constant 0 : index
    %c0_24 = arith.constant 0 : index
    %32 = vector.load %arg10[%c0_23, %c0_24] : memref<1x128xf32, #tpu.memory_space<vmem>>, vector<1x128xf32>
    tpu.vector_store %arg10[%c0_23, %c0_24], %31 {strides = array<i32>} : memref<1x128xf32, #tpu.memory_space<vmem>>, vector<1x128xf32>,
    return
  }
  func.func @transform_0(%arg0: i32) -> (i32, i32) {
    %c0_i32 = arith.constant 0 : i32
    %c0_i32_0 = arith.constant 0 : i32
    return %c0_i32, %arg0 : i32, i32
  }
  func.func @transform_1(%arg0: i32) -> (i32, i32) {
    %c0_i32 = arith.constant 0 : i32
    %c0_i32_0 = arith.constant 0 : i32
    %c0_i32_1 = arith.constant 0 : i32
    return %c0_i32, %c0_i32_0 : i32, i32
  }
  func.func @transform_2(%arg0: i32) -> (i32, i32) {
    %c0_i32 = arith.constant 0 : i32
    %c0_i32_0 = arith.constant 0 : i32
    %c0_i32_1 = arith.constant 0 : i32
    return %c0_i32, %c0_i32_0 : i32, i32
  }
  func.func @transform_3(%arg0: i32) -> (i32, i32) {
    %c0_i32 = arith.constant 0 : i32
    %c0_i32_0 = arith.constant 0 : i32
    %c0_i32_1 = arith.constant 0 : i32
    return %c0_i32, %c0_i32_0 : i32, i32
  }
  func.func @transform_4(%arg0: i32) -> (i32, i32) {
    %c0_i32 = arith.constant 0 : i32
    %c0_i32_0 = arith.constant 0 : i32
    %c0_i32_1 = arith.constant 0 : i32
    return %c0_i32, %c0_i32_0 : i32, i32
  }
  func.func @transform_5(%arg0: i32) -> (i32, i32) {
    %c0_i32 = arith.constant 0 : i32
    %c0_i32_0 = arith.constant 0 : i32
    %c0_i32_1 = arith.constant 0 : i32
    return %c0_i32, %c0_i32_0 : i32, i32
  }
  func.func @transform_6(%arg0: i32) -> (i32, i32) {
    %c0_i32 = arith.constant 0 : i32
    %c0_i32_0 = arith.constant 0 : i32
    %c0_i32_1 = arith.constant 0 : i32
    return %c0_i32, %c0_i32_0 : i32, i32
  }
  func.func @transform_7(%arg0: i32) -> (i32, i32) {
    %c0_i32 = arith.constant 0 : i32
    %c0_i32_0 = arith.constant 0 : i32
    %c0_i32_1 = arith.constant 0 : i32
    return %c0_i32, %c0_i32_0 : i32, i32
  }
  func.func @transform_8(%arg0: i32) -> (i32, i32) {
    %c0_i32 = arith.constant 0 : i32
    %c0_i32_0 = arith.constant 0 : i32
    %c0_i32_1 = arith.constant 0 : i32
    return %c0_i32, %c0_i32_0 : i32, i32
  }
  func.func @transform_9(%arg0: i32) -> (i32, i32) {
    %c0_i32 = arith.constant 0 : i32
    %c0_i32_0 = arith.constant 0 : i32
    return %c0_i32, %arg0 : i32, i32
  }
}

</mosaic_0001>

<bundles_post_ra>
// kernel: tpu_custom_call.1
= control target key start
LH: loop header
LB: loop body
LE: loop exit
PB: predicated region body
PF: predicated region fallthrough
CT: control target
= control target key end

     0   :  { %s656_s0 = inlined_call_operand.vmem [shape: bf16[16,128], index: 0, kind: input, shape index: {}]   ;;  %s657_s1 = inlined_call_operand.vmem [shape: bf16[64,16], index: 1, kind: input, shape index: {}]   ;;  %s658_s2 = inlined_call_operand.vmem [shape: f32[64,1], index: 2, kind: input, shape index: {}]   ;;  %s659_s3 = inlined_call_operand.vmem [shape: bf16[32,64], index: 3, kind: input, shape index: {}]   ;;  %s660_s4 = inlined_call_operand.vmem [shape: f32[32,1], index: 4, kind: input, shape index: {}]   ;;  %s661_s5 = inlined_call_operand.vmem [shape: bf16[16,32], index: 5, kind: input, shape index: {}]   ;;  %s662_s6 = inlined_call_operand.vmem [shape: f32[16,1], index: 6, kind: input, shape index: {}]   ;;  %s663_s7 = inlined_call_operand.vmem [shape: f32[16,1], index: 7, kind: input, shape index: {}]   ;;  %s664_s8 = inlined_call_operand.<no memory space> [shape: f32[1,1], index: 8, kind: input, shape index: {}]   ;;  %s665_s9 = inlined_call_operand.hbm [shape: f32[1,128], index: 9, kind: output, shape index: {}]  }
   0x1   :  { %v14_v0 = vstv %s664_s8 }
   0x2   :  { %15 = vst [vmem:[#allocation2] sm:$0x1] %v14_v0 }
   0x3   :  { %v488_v1 = vld [vmem:[%s656_s0] sm:$0xff]   ;;  %vm120_vm0 = vcmask 130048   ;;  %v490_v3 = vld [vmem:[%s657_s1 + $0x8] sm:$0xff]   ;;  %v518_v4 = vmov 0   ;;  %v491_v5 = vld [vmem:[%s657_s1 + $0x10] sm:$0xff]  }
   0x4   :  { %v489_v2 = vld [vmem:[%s657_s1] sm:$0xff]   ;;  %452 = vmatprep.subr.bf16.mxu0 %v488_v1  ;;  %486 = vset.pattern.permute.xlu0 %v518_v4  ;;  %v52_v6 = vld [vmem:[%s658_s2 + $0x30] sm:$0xff]  ;;  %v53_v8 = vld [vmem:[%s658_s2 + $0x38] sm:$0xff] }
   0x5   :  { %453 = vmatpush3.bf16.msra.mxu0 %v488_v1  ;;  %454 = vmatprep.mubr.msk.bf16.mxu0 %vm120_vm0, %v489_v2  ;;  %v50_v7 = vld [vmem:[%s658_s2 + $0x20] sm:$0xff]  ;;  %v51_v9 = vld [vmem:[%s658_s2 + $0x28] sm:$0xff]  ;;  %v492_v10 = vld [vmem:[%s657_s1 + $0x18] sm:$0xff]  }
   0x6   :  { %487 = vset.pattern.permute.xlu1 %v518_v4  ;;  %86 = vperm.xlu0 %486, %v52_v6   ;;  %v48_v11 = vld [vmem:[%s658_s2 + $0x10] sm:$0xff]  ;;  %v49_v12 = vld [vmem:[%s658_s2 + $0x18] sm:$0xff] }
   0x7   :  { %76 = vperm.xlu1 %487, %v50_v7  }
   0x8   :  { %455 = vmatmul.mubr.msk.bf16.vlgmr.msra.gmra.mxu0 %vm120_vm0, %v490_v3 }
   0x9   :  { %458 = vmatprep.mubr.msk.bf16.mxu0 %vm120_vm0, %v491_v5 }
   0xa   :  { %91 = vperm.xlu0 %486, %v53_v8  }
   0xb   :  { %81 = vperm.xlu1 %487, %v51_v9  }
   0xc   :  { %16 = vsyncpa [#allocation4], 0  ;;  %v46_v13 = vld [vmem:[%s658_s2] sm:$0xff]  ;;  %v47_v14 = vld [vmem:[%s658_s2 + $0x8] sm:$0xff]  ;;  %vm248_vm1 = vcmask 523264   ;;  %v519_v62 = vmov 0.0  }
   0xd   :  { %v216_v15 = vld [vmem:[%s660_s4 + $0x10] sm:$0xff]  ;;  %v217_v16 = vld [vmem:[%s660_s4 + $0x18] sm:$0xff]  ;;  %v214_v17 = vld [vmem:[%s660_s4] sm:$0xff]  ;;  %474 = vmatprep.subr.bf16.mxu0 %v519_v62  ;;  %vm520_vm2 = vmmov 0   ;;  %vm329_vm3 = vcmask 261120  }
   0xe   :  { %66 = vperm.xlu0 %486, %v48_v11   ;;  %v215_v18 = vld [vmem:[%s660_s4 + $0x8] sm:$0xff]  ;;  %v312_v19 = vld [vmem:[%s662_s6] sm:$0xff] }
   0xf   :  { %71 = vperm.xlu1 %487, %v49_v12   ;;  %v313_v20 = vld [vmem:[%s662_s6 + $0x8] sm:$0xff]  ;;  %v376_v21 = vld [vmem:[%s663_s7] sm:$0xff] }
  0x10   :  { %459 = vmatmul.mubr.msk.bf16.gmra.mxu0 %vm120_vm0, %v492_v10  ;;  %v377_v22 = vld [vmem:[%s663_s7 + $0x8] sm:$0xff]  ;;  %v397_v23 = vld [vmem:[#allocation2] sm:$0x1] }
  0x11   :  { %v493_v24 = vld [vmem:[%s659_s3] sm:$0xff]   ;;  %v494_v61 = vld [vmem:[%s659_s3 + $0x8] sm:$0xff]   ;;  %478 = vmatprep.mubr.msk.bf16.mxu0 %vm520_vm2, %v519_v62 }
  0x12   :  { %56 = vperm.xlu0 %486, %v46_v13   ;;  %470 = vmatprep.mubr.msk.bf16.mxu1 %vm248_vm1, %v493_v24 }
  0x13   :  { %61 = vperm.xlu1 %487, %v47_v14  }
  0x16   :  { %230 = vperm.xlu0 %486, %v216_v15  }
  0x17   :  { %235 = vperm.xlu1 %487, %v217_v16  }
  0x1a   :  { %220 = vperm.xlu0 %486, %v214_v17   ;;  %v495_v17 = vld [vmem:[%s661_s5] sm:$0xff]   ;;  %s521_s5 = smov [#allocation3]  }
  0x1b   :  { %225 = vperm.xlu1 %487, %v215_v18   ;;  %s415_s28 = sshll.u32 %s521_s5, 4  ;;  %s416_s28 = int_to_ptr.vmem [resolvable:$true] %s415_s28 }
  0x1c   :  { %s496_s29 = scalar_lea.vmem %s416_s28, 16  ;;  %s500_s30 = scalar_lea.vmem %s416_s28, 32 }
  0x1d   :  { %p497_p0 = scmp.ne.s32.totalorder %s416_s28, %s496_s29  ;;  %p501_p1 = scmp.lt.s32.totalorder %s416_s28, %s416_s28 }
  0x1e   :  { %316 = vperm.xlu0 %486, %v312_v19   ;;  %p502_p2 = scmp.lt.s32.totalorder %s500_s30, %s496_s29 }
  0x1f   :  { %321 = vperm.xlu1 %487, %v313_v20  }
  0x20   :  { %p503_p3 = por %p502_p2, %p501_p1 }
  0x22   :  { %380 = vperm.xlu0 %486, %v376_v21   ;;  %p504_p4 = pnand %p503_p3, %p497_p0 }
  0x23   :  { %385 = vperm.xlu1 %487, %v377_v22  }
  0x26   :  { %400 = vperm.xlu0 %486, %v397_v23  }
  0x81   :  { %v87_v27 = vpop.permute.xlu0 %86 }
  0x82   :  { %v77_v25 = vpop.permute.xlu1 %76 }
  0x85   :  { %v92_v32 = vpop.permute.xlu0 %91 }
  0x86   :  { %v82_v30 = vpop.permute.xlu1 %81 }
  0x89   :  { %v67_v40 = vpop.permute.xlu0 %66 }
  0x8a   :  { %v72_v36 = vpop.permute.xlu1 %71 }
  0x8d   :  { %v57_v54 = vpop.permute.xlu0 %56 }
  0x8e   :  { %v62_v50 = vpop.permute.xlu1 %61 }
  0x91   :  { %v231_v63 = vpop.permute.xlu0 %230 }
  0x92   :  { %v236_v0 = vpop.permute.xlu1 %235 }
  0x95   :  { %v221_v5 = vpop.permute.xlu0 %220 }
  0x96   :  { %v226_v7 = vpop.permute.xlu1 %225 }
  0x99   :  { %v317_v18 = vpop.permute.xlu0 %316 }
  0x9a   :  { %v322_v21 = vpop.permute.xlu1 %321 }
  0xc8   :  { %v456_v26 = vpop.f32.mrf.mxu0 }
  0xc9   :  { %v176_v46 = vadd.f32 %v456_v26, %v67_v40 }
  0xca   :  { %v167_v28 = vpop.f32.mrf.mxu0 }
  0xcb   :  { %v200_v55 = vmax.f32 %v176_v46, 0.0  ;;  %v168_v56 = vadd.f32 %v167_v28, %v57_v54  ;;  %v381_v28 = vpop.permute.xlu0 %380 }
  0xcc   :  { %v457_v29 = vpop.f32.mrf.mxu0 }
  0xcd   :  { %v179_v42 = vadd.f32 %v457_v29, %v72_v36  ;;  %v198_v59 = vmax.f32 %v168_v56, 0.0  ;;  %v386_v29 = vpop.permute.xlu1 %385 }
  0xce   :  { %v170_v31 = vpop.f32.mrf.mxu0 }
  0xcf   :  { %v201_v51 = vmax.f32 %v179_v42, 0.0  ;;  %v171_v52 = vadd.f32 %v170_v31, %v62_v50  ;;  %v401_v40 = vpop.permute.xlu0 %400 }
  0xd0   :  { %v460_v33 = vpop.f32.mrf.mxu0 }
  0xd1   :  { %v192_v35 = vadd.f32 %v460_v33, %v87_v27  ;;  %v207_v57 = vpack.c.bf16 %v201_v51, %v200_v55  ;;  %v199_v58 = vmax.f32 %v171_v52, 0.0 }
  0xd2   :  { %v183_v34 = vpop.f32.mrf.mxu0 }
  0xd3   :  { %v184_v38 = vadd.f32 %v183_v34, %v77_v25  ;;  %v204_v43 = vmax.f32 %v192_v35, 0.0  ;;  %v206_v60 = vpack.c.bf16 %v199_v58, %v198_v59 }
  0xd4   :  { %v461_v37 = vpop.f32.mrf.mxu0 }
  0xd5   :  { %v195_v39 = vadd.f32 %v461_v37, %v92_v32  ;;  %v202_v47 = vmax.f32 %v184_v38, 0.0  ;;  %v403_v32 = vlaneseq }
  0xd6   :  { %v186_v41 = vpop.f32.mrf.mxu0 }
  0xd7   :  { %v205_v44 = vmax.f32 %v195_v39, 0.0  ;;  %v187_v45 = vadd.f32 %v186_v41, %v82_v30  ;;  %v404_v35 = vshrl.u32 %v403_v32, 7 }
  0xd9   :  { %v203_v48 = vmax.f32 %v187_v45, 0.0  ;;  %v209_v49 = vpack.c.bf16 %v205_v44, %v204_v43  ;;  %v405_v38 = vsub.s32 0, %v404_v35 }
  0xdb   :  { %v208_v53 = vpack.c.bf16 %v203_v48, %v202_v47  ;;  %462 = vmatprep.subr.bf16.mxu1 %v209_v49  ;;  %v406_v42 = vrot.slane %v401_v40, %v405_v38 }
  0xdc   :  { %463 = vmatpush3.bf16.msra.mxu1 %v209_v49 }
  0xdd   :  { %464 = vmatprep.subr.bf16.mxu1 %v208_v53 }
  0xe0   :  { %465 = vmatpush3.bf16.msra.mxu1 %v208_v53 }
  0xe1   :  { %466 = vmatprep.subr.bf16.mxu1 %v207_v57 }
  0xe4   :  { %467 = vmatpush3.bf16.msra.mxu1 %v207_v57 }
  0xe5   :  { %468 = vmatprep.subr.bf16.mxu1 %v206_v60 }
  0xe8   :  { %469 = vmatpush3.bf16.msra.mxu1 %v206_v60 }
  0xeb   :  { %471 = vmatmul.mubr.msk.bf16.vlgmr.msra.gmra.mxu1 %vm248_vm1, %v494_v61 }
 0x1ab   :  { %v472_v1 = vpop.f32.mrf.mxu1 }
 0x1ac   :  { %v298_v3 = vadd.f32 %v472_v1, %v231_v63 }
 0x1ad   :  { %v289_v2 = vpop.f32.mrf.mxu1 }
 0x1ae   :  { %v306_v9 = vmax.f32 %v298_v3, 0.0  ;;  %v290_v10 = vadd.f32 %v289_v2, %v221_v5 }
 0x1af   :  { %v473_v4 = vpop.f32.mrf.mxu1 }
 0x1b0   :  { %v301_v6 = vadd.f32 %v473_v4, %v236_v0  ;;  %v304_v15 = vmax.f32 %v290_v10, 0.0 }
 0x1b1   :  { %v292_v8 = vpop.f32.mrf.mxu1 }
 0x1b2   :  { %v307_v11 = vmax.f32 %v301_v6, 0.0  ;;  %v293_v12 = vadd.f32 %v292_v8, %v226_v7 }
 0x1b4   :  { %v309_v13 = vpack.c.bf16 %v307_v11, %v306_v9  ;;  %v305_v14 = vmax.f32 %v293_v12, 0.0 }
 0x1b6   :  { %475 = vmatpush3.bf16.msra.mxu0 %v309_v13  ;;  %v308_v16 = vpack.c.bf16 %v305_v14, %v304_v15 }
 0x1b7   :  { %476 = vmatprep.subr.bf16.mxu0 %v519_v62 }
 0x1ba   :  { %477 = vmatpush3.bf16.msra.mxu0 %v308_v16 }
 0x1bd   :  { %479 = vmatmul.mubr.msk.bf16.vlgmr.msra.gmra.mxu0 %vm329_vm3, %v495_v17 }
 0x27d   :  { %v367_v19 = vpop.f32.mrf.mxu0 }
 0x27e   :  { %v368_v20 = vadd.f32 %v367_v19, %v317_v18 }
 0x27f   :  { %v480_v22 = vpop.f32.mrf.mxu0 }
 0x280   :  { %v374_v24 = vmax.f32 %v368_v20, 0.0 }
 0x281   :  { %v370_v23 = vpop.f32.mrf.mxu0 }
 0x282   :  { %v371_v25 = vadd.f32 %v370_v23, %v322_v21  ;;  %v388_v30 = vmul.f32 %v381_v28, %v374_v24 }
 0x283   :  { %v481_v26 = vpop.f32.mrf.mxu0 }
 0x284   :  { %v375_v27 = vmax.f32 %v371_v25, 0.0 }
 0x286   :  { %v389_v31 = vmul.f32 %v386_v29, %v375_v27 }
 0x288   :  { %v390_v33 = vadd.f32 %v389_v31, %v388_v30 }
 0x28a   :  { %v391_v34 = vrot.slane %v390_v33, 4 }
 0x28c   :  { %v392_v36 = vadd.f32 %v391_v34, %v390_v33 }
 0x28e   :  { %v393_v37 = vrot.slane %v392_v36, 2 }
 0x290   :  { %v394_v39 = vadd.f32 %v393_v37, %v392_v36 }
 0x292   :  { %v395_v41 = vrot.slane %v394_v39, 1 }
 0x294   :  { %v396_v43 = vadd.f32 %v395_v41, %v394_v39 }
 0x296   :  { %v407_v44 = vadd.f32 %v406_v42, %v396_v43 }
 0x298   :  { %408 = vst [vmem:[#allocation3] sm:$0x1] %v407_v44 }
 0x299   :  { %507 = shalt.err (!%p504_p4)
}
 0x29a   :  { %418 = dma.vmem_to_hbm [thread:$0]  %s416_s28, 16, %s665_s9, [#allocation4]  }
 0x29b   :  { %516 = dma.done.wait [#allocation4], 16  }
 0x29c   :  { %517 = vsyncadd [#allocation4], 4294967280 }
 0x29d   :  { %422 = vsyncpa [#allocation4], 1 }

</bundles_post_ra>
